<compile_context>
chip_gen: v5e
topology: v5e:2x2
jax: 0.10.0
libtpu: 0.0.40
codegen_flags: <defaults>
</compile_context>

<pallas_src>
import functools

import jax
import jax.numpy as jnp
from jax.experimental import pallas as pl
from jax.experimental.pallas import tpu as pltpu

EPS = 1e-5
OUT_CH = 3

_VMEM_LIMIT = 48 * 1024 * 1024   # safe on v7x (64 MiB phys) and roomy on v5e/v6e (128 MiB)
_STATS_MAX_LANES = 16384         # lane-tile cap for the stats pass
_STATS_ELEM_CAP = 512 * 1024     # rows*lanes cap for stats block (~8 MiB VMEM incl. accs)
_APPLY_MAX_LANES = 16384         # lane-tile cap for the apply pass
_APPLY_ELEM_CAP = 160 * 1024     # rows*lanes cap for apply block (~20 MiB VMEM incl. 8/3 pad)


# --------------------------------------------------------------------------------------------
# tiling helpers (all trace-time Python ints)
# --------------------------------------------------------------------------------------------
def _largest_lane_tile(hw_pad: int, cap: int) -> int:
    """Largest multiple of 128 that divides hw_pad and is <= cap (hw_pad % 128 == 0)."""
    cap = min(hw_pad, cap)
    best, t = 128, 128
    while t <= cap:
        if hw_pad % t == 0:
            best = t
        t += 128
    return best


def _largest_divisor_leq(n: int, cap: int) -> int:
    """Largest divisor of n that is <= cap (used for LEADING block dims, unconstrained)."""
    cap = max(1, min(n, cap))
    for d in range(cap, 0, -1):
        if n % d == 0:
            return d
    return 1


def _stats_row_block(n: int, cap: int) -> int:
    """Row block for the 2-D stats tile: must be == n (full) or a multiple-of-8 divisor of n
    (it is the second-minor dim, so it must satisfy the (8,128) rule)."""
    if n <= cap:
        return n
    best = 0
    for d in range(8, cap + 1, 8):
        if n % d == 0:
            best = d
    # TODO(synk): pathological huge prime N falls back to the full batch (may be VMEM-heavy).
    return best if best > 0 else n


# --------------------------------------------------------------------------------------------
# pass 1: batch statistics of x (sum, sum of squares)
# --------------------------------------------------------------------------------------------
def _stats_kernel(x_ref, sums_ref, acc1_ref, acc2_ref):
    # x_ref   : VMEM (rbs, ts) block of x
    # sums_ref: SMEM (2,) resident output, written on the last step only
    # acc1/2  : VMEM (rbs, ts) f32 accumulators, persist across the whole grid
    step = pl.program_id(0) * pl.num_programs(1) + pl.program_id(1)
    nsteps = pl.num_programs(0) * pl.num_programs(1)

    x = x_ref[...].astype(jnp.float32)

    @pl.when(step == 0)
    def _init():
        acc1_ref[...] = jnp.zeros_like(acc1_ref)
        acc2_ref[...] = jnp.zeros_like(acc2_ref)
        sums_ref[0] = jnp.float32(0.0)
        sums_ref[1] = jnp.float32(0.0)

    acc1_ref[...] = acc1_ref[...] + x
    acc2_ref[...] = acc2_ref[...] + x * x

    @pl.when(step == nsteps - 1)
    def _final():
        sums_ref[0] = jnp.sum(acc1_ref[...])
        sums_ref[1] = jnp.sum(acc2_ref[...])


# --------------------------------------------------------------------------------------------
# pass 2: out[n, c, :] = relu(a_c * x[n, :] + b_c)
# --------------------------------------------------------------------------------------------
def _make_apply_kernel(row_block: int):
    unroll = min(row_block, 8)

    def _apply_kernel(a_ref, b_ref, x_ref, o_ref):
        # a_ref/b_ref: VMEM (1, 3, 1) folded per-channel scale / shift
        # x_ref      : VMEM (rb, 1, T) block of x
        # o_ref      : VMEM (rb, 3, T) output block
        a3 = a_ref[...]                                   # (1, 3, 1)
        b3 = b_ref[...]

        def body(r, carry):
            xr = x_ref[pl.ds(r, 1), :, :].astype(jnp.float32)        # (1, 1, T)
            # (1,3,1) * (1,1,T) -> (1,3,T): lane + sublane broadcasts only, ONE coalesced store.
            o_ref[pl.ds(r, 1), :, :] = jnp.maximum(a3 * xr + b3, 0.0)
            return carry

        jax.lax.fori_loop(0, row_block, body, 0, unroll=unroll)

    return _apply_kernel


# --------------------------------------------------------------------------------------------
# wrapper
# --------------------------------------------------------------------------------------------
def first_conv(x, w, gamma, beta, *,
               stats_lane_cap=_STATS_MAX_LANES,
               apply_lane_cap=_APPLY_MAX_LANES,
               stats_elem_cap=_STATS_ELEM_CAP,
               apply_elem_cap=_APPLY_ELEM_CAP):
    """x: (N, 1, H, W) -> (N, 3, H, W) f32.  Conv2d(1->3,1,bias=False) + BN(batch stats) + ReLU."""
    N, C, H, W = x.shape
    assert C == 1, "First_Conv expects a single input channel"
    hw = H * W
    hw_pad = -(-hw // 128) * 128

    x2d = x.reshape(N, hw)
    if hw_pad != hw:
        # zero padding does not perturb sum / sum-of-squares; mean uses the true count.
        x2d = jnp.pad(x2d, ((0, 0), (0, hw_pad - hw)))

    # ---------------- pass 1: stats over x ----------------------------------------------
    ts = _largest_lane_tile(hw_pad, min(stats_lane_cap, stats_elem_cap))
    rbs = _stats_row_block(N, max(1, stats_elem_cap // ts))
    grid_s = (N // rbs, hw_pad // ts)

    sums = pl.pallas_call(
        _stats_kernel,
        out_shape=jax.ShapeDtypeStruct((2,), jnp.float32),
        grid=grid_s,
        in_specs=[pl.BlockSpec((rbs, ts), lambda r, t: (r, t))],
        out_specs=pl.BlockSpec(memory_space=pltpu.SMEM),
        scratch_shapes=[pltpu.VMEM((rbs, ts), jnp.float32),
                        pltpu.VMEM((rbs, ts), jnp.float32)],
        compiler_params=pltpu.CompilerParams(
            dimension_semantics=("arbitrary", "arbitrary"),   # carried VMEM accumulator
            vmem_limit_bytes=_VMEM_LIMIT,
        ),
    )(x2d)

    count = jnp.float32(N * hw)
    mean_x = sums[0] / count
    # NOTE: E[x^2]-E[x]^2 in f32 can lose precision for very large, non-centered inputs.
    var_x = jnp.maximum(sums[1] / count - mean_x * mean_x, 0.0)   # biased variance (BN forward)

    wf = w.reshape(-1).astype(jnp.float32)
    assert wf.shape == (OUT_CH,)
    g = gamma.reshape(-1).astype(jnp.float32)
    bt = beta.reshape(-1).astype(jnp.float32)
    inv_std = jax.lax.rsqrt(wf * wf * var_x + EPS)                # (3,)
    a3 = (wf * g * inv_std).reshape(1, OUT_CH, 1)                 # folded scale
    b3 = (bt - wf * mean_x * g * inv_std).reshape(1, OUT_CH, 1)   # folded shift

    # ---------------- pass 2: fused relu(a_c*x + b_c) -----------------------------------
    x3d = x2d.reshape(N, 1, hw_pad)                               # metadata-only reshape
    ta = _largest_lane_tile(hw_pad, min(apply_lane_cap, apply_elem_cap))
    rba = _largest_divisor_leq(N, max(1, apply_elem_cap // ta))   # leading dim: unconstrained
    grid_a = (N // rba, hw_pad // ta)

    out = pl.pallas_call(
        _make_apply_kernel(rba),
        out_shape=jax.ShapeDtypeStruct((N, OUT_CH, hw_pad), jnp.float32),
        grid=grid_a,
        in_specs=[
            pl.BlockSpec((1, OUT_CH, 1), lambda r, t: (0, 0, 0)),   # a (fetched once)
            pl.BlockSpec((1, OUT_CH, 1), lambda r, t: (0, 0, 0)),   # b (fetched once)
            pl.BlockSpec((rba, 1, ta), lambda r, t: (r, 0, t)),     # x tile
        ],
        out_specs=pl.BlockSpec((rba, OUT_CH, ta), lambda r, t: (r, 0, t)),
        compiler_params=pltpu.CompilerParams(
            dimension_semantics=("parallel", "parallel"),           # independent tiles
            vmem_limit_bytes=_VMEM_LIMIT,
        ),
    )(a3, b3, x3d)

    if hw_pad != hw:
        out = out[..., :hw]
    return out.reshape(N, OUT_CH, H, W)                            # pure reshape, no transpose


# --------------------------------------------------------------------------------------------
# pure-JAX reference (PyTorch semantics: 1x1 conv no bias, BN training-mode batch stats, ReLU)
# --------------------------------------------------------------------------------------------
def reference(x, w, gamma, beta):
    y = x[:, 0][:, None, :, :] * w.reshape(-1)[None, :, None, None]
    mean = jnp.mean(y, axis=(0, 2, 3), keepdims=True)
    var = jnp.mean((y - mean) ** 2, axis=(0, 2, 3), keepdims=True)     # biased
    yn = (y - mean) / jnp.sqrt(var + EPS)
    yn = yn * gamma[None, :, None, None] + beta[None, :, None, None]
    return jnp.maximum(yn, 0.0)


if __name__ == "__main__":
    key = jax.random.PRNGKey(0)
    kx, kw, kg, kb = jax.random.split(key, 4)

    w = jax.random.normal(kw, (OUT_CH,), dtype=jnp.float32)            # conv weight (3,1,1,1)->(3,)
    gamma = 1.0 + 0.1 * jax.random.normal(kg, (OUT_CH,), dtype=jnp.float32)
    beta = 0.1 * jax.random.normal(kb, (OUT_CH,), dtype=jnp.float32)

    def check(shape, **caps):
        xin = jax.random.normal(kx, shape, dtype=jnp.float32)
        fn = jax.jit(functools.partial(first_conv, **caps))
        got = jax.block_until_ready(fn(xin, w, gamma, beta))
        ref = reference(xin, w, gamma, beta)
        assert got.shape == ref.shape
        assert jnp.allclose(got, ref, atol=1e-4, rtol=1e-4), f"mismatch vs reference for {shape}"

    # 1) spec-sized input, H*W a multiple of 128 (single-tile grids)
    check((2, 1, 16, 16))
    # 2) H*W NOT a multiple of 128 -> exercises the lane-padding path
    check((2, 1, 12, 12))
    # 3) small caps -> multi-step grids: exercises cross-step stats accumulation + row/lane tiling
    check((4, 1, 32, 32),
          stats_lane_cap=128, apply_lane_cap=128,
          stats_elem_cap=256, apply_elem_cap=256)

    print("KERNEL_OK")
</pallas_src>

<mosaic_0001>
module attributes {stable_mosaic.version = 11 : i64} {
  func.func @_stats_kernel(%arg0: i32, %arg1: i32, %arg2: memref<2x256xf32, #tpu.memory_space<vmem>>, %arg3: memref<2xf32, #tpu.memory_space<smem>>, %arg4: memref<2x256xf32, #tpu.memory_space<vmem>>, %arg5: memref<2x256xf32, #tpu.memory_space<vmem>>) attributes {dimension_semantics = [#tpu.dimension_semantics<arbitrary>, #tpu.dimension_semantics<arbitrary>], iteration_bounds = array<i64: 1, 1>, scalar_prefetch = 0 : i64, scratch_operands = 2 : i64, tpu.core_type = #tpu.core_type<tc>, window_params = [{transform_indices = @transform_0, window_bounds = array<i64: 2, 256>}, {transform_indices = @transform_1, window_bounds = array<i64: 2>}]} {
    %c1_i32 = arith.constant 1 : i32
    %0 = arith.muli %arg0, %c1_i32 : i32
    %1 = arith.addi %0, %arg1 : i32
    %c0 = arith.constant 0 : index
    %c0_0 = arith.constant 0 : index
    %2 = vector.load %arg2[%c0, %c0_0] : memref<2x256xf32, #tpu.memory_space<vmem>>, vector<2x256xf32>
    %c0_i32 = arith.constant 0 : i32
    %3 = arith.cmpi eq, %1, %c0_i32 : i32
    %4 = arith.extui %3 : i1 to i32
    %c0_i32_1 = arith.constant 0 : i32
    %5 = arith.cmpi ne, %4, %c0_i32_1 : i32
    scf.if %5 {
      %cst = arith.constant 0.000000e+00 : f32
      %16 = vector.broadcast %cst : f32 to vector<2x256xf32>
      %c0_12 = arith.constant 0 : index
      %c0_13 = arith.constant 0 : index
      %17 = vector.load %arg4[%c0_12, %c0_13] : memref<2x256xf32, #tpu.memory_space<vmem>>, vector<2x256xf32>
      tpu.vector_store %arg4[%c0_12, %c0_13], %16 {strides = array<i32>} : memref<2x256xf32, #tpu.memory_space<vmem>>, vector<2x256xf32>,
      %cst_14 = arith.constant 0.000000e+00 : f32
      %18 = vector.broadcast %cst_14 : f32 to vector<2x256xf32>
      %c0_15 = arith.constant 0 : index
      %c0_16 = arith.constant 0 : index
      %19 = vector.load %arg5[%c0_15, %c0_16] : memref<2x256xf32, #tpu.memory_space<vmem>>, vector<2x256xf32>
      tpu.vector_store %arg5[%c0_15, %c0_16], %18 {strides = array<i32>} : memref<2x256xf32, #tpu.memory_space<vmem>>, vector<2x256xf32>,
      %cst_17 = arith.constant 0.000000e+00 : f32
      %c0_18 = arith.constant 0 : index
      %20 = memref.load %arg3[%c0_18] : memref<2xf32, #tpu.memory_space<smem>>
      memref.store %cst_17, %arg3[%c0_18] : memref<2xf32, #tpu.memory_space<smem>>
      %cst_19 = arith.constant 0.000000e+00 : f32
      %c1 = arith.constant 1 : index
      %21 = memref.load %arg3[%c1] : memref<2xf32, #tpu.memory_space<smem>>
      memref.store %cst_19, %arg3[%c1] : memref<2xf32, #tpu.memory_space<smem>>
    } else {
    }
    %c0_2 = arith.constant 0 : index
    %c0_3 = arith.constant 0 : index
    %6 = vector.load %arg4[%c0_2, %c0_3] : memref<2x256xf32, #tpu.memory_space<vmem>>, vector<2x256xf32>
    %7 = arith.addf %6, %2 : vector<2x256xf32>
    %c0_4 = arith.constant 0 : index
    %c0_5 = arith.constant 0 : index
    %8 = vector.load %arg4[%c0_4, %c0_5] : memref<2x256xf32, #tpu.memory_space<vmem>>, vector<2x256xf32>
    tpu.vector_store %arg4[%c0_4, %c0_5], %7 {strides = array<i32>} : memref<2x256xf32, #tpu.memory_space<vmem>>, vector<2x256xf32>,
    %c0_6 = arith.constant 0 : index
    %c0_7 = arith.constant 0 : index
    %9 = vector.load %arg5[%c0_6, %c0_7] : memref<2x256xf32, #tpu.memory_space<vmem>>, vector<2x256xf32>
    %10 = arith.mulf %2, %2 : vector<2x256xf32>
    %11 = arith.addf %9, %10 : vector<2x256xf32>
    %c0_8 = arith.constant 0 : index
    %c0_9 = arith.constant 0 : index
    %12 = vector.load %arg5[%c0_8, %c0_9] : memref<2x256xf32, #tpu.memory_space<vmem>>, vector<2x256xf32>
    tpu.vector_store %arg5[%c0_8, %c0_9], %11 {strides = array<i32>} : memref<2x256xf32, #tpu.memory_space<vmem>>, vector<2x256xf32>,
    %c0_i32_10 = arith.constant 0 : i32
    %13 = arith.cmpi eq, %1, %c0_i32_10 : i32
    %14 = arith.extui %13 : i1 to i32
    %c0_i32_11 = arith.constant 0 : i32
    %15 = arith.cmpi ne, %14, %c0_i32_11 : i32
    scf.if %15 {
      %c0_12 = arith.constant 0 : index
      %c0_13 = arith.constant 0 : index
      %16 = vector.load %arg4[%c0_12, %c0_13] : memref<2x256xf32, #tpu.memory_space<vmem>>, vector<2x256xf32>
      %17 = vector.shape_cast %16 : vector<2x256xf32> to vector<1x2x256xf32>
      %cst = arith.constant dense<0.000000e+00> : vector<1xf32>
      %18 = vector.multi_reduction <add>, %17, %cst [1, 2] : vector<1x2x256xf32> to vector<1xf32>
      %19 = vector.shape_cast %18 : vector<1xf32> to vector<1x1x1xf32>
      %20 = vector.extract %19[0, 0, 0] : f32 from vector<1x1x1xf32>
      %c0_14 = arith.constant 0 : index
      %21 = memref.load %arg3[%c0_14] : memref<2xf32, #tpu.memory_space<smem>>
      memref.store %20, %arg3[%c0_14] : memref<2xf32, #tpu.memory_space<smem>>
      %c0_15 = arith.constant 0 : index
      %c0_16 = arith.constant 0 : index
      %22 = vector.load %arg5[%c0_15, %c0_16] : memref<2x256xf32, #tpu.memory_space<vmem>>, vector<2x256xf32>
      %23 = vector.shape_cast %22 : vector<2x256xf32> to vector<1x2x256xf32>
      %cst_17 = arith.constant dense<0.000000e+00> : vector<1xf32>
      %24 = vector.multi_reduction <add>, %23, %cst_17 [1, 2] : vector<1x2x256xf32> to vector<1xf32>
      %25 = vector.shape_cast %24 : vector<1xf32> to vector<1x1x1xf32>
      %26 = vector.extract %25[0, 0, 0] : f32 from vector<1x1x1xf32>
      %c1 = arith.constant 1 : index
      %27 = memref.load %arg3[%c1] : memref<2xf32, #tpu.memory_space<smem>>
      memref.store %26, %arg3[%c1] : memref<2xf32, #tpu.memory_space<smem>>
    } else {
    }
    return
  }
  func.func @transform_0(%arg0: i32, %arg1: i32) -> (i32, i32) {
    %c0_i32 = arith.constant 0 : i32
    return %arg0, %arg1 : i32, i32
  }
  func.func @transform_1(%arg0: i32, %arg1: i32) -> i32 {
    %c0_i32 = arith.constant 0 : i32
    %c0_i32_0 = arith.constant 0 : i32
    return %c0_i32 : i32
  }
}

module attributes {stable_mosaic.version = 11 : i64} {
  func.func @_apply_kernel(%arg0: i32, %arg1: i32, %arg2: memref<1x3x1xf32, #tpu.memory_space<vmem>>, %arg3: memref<1x3x1xf32, #tpu.memory_space<vmem>>, %arg4: memref<2x1x256xf32, #tpu.memory_space<vmem>>, %arg5: memref<2x3x256xf32, #tpu.memory_space<vmem>>) attributes {dimension_semantics = [#tpu.dimension_semantics<parallel>, #tpu.dimension_semantics<parallel>], iteration_bounds = array<i64: 1, 1>, scalar_prefetch = 0 : i64, scratch_operands = 0 : i64, tpu.core_type = #tpu.core_type<tc>, window_params = [{pipeline_mode = #tpu.pipeline_mode<synchronous>, transform_indices = @transform_0, window_bounds = array<i64: 1, 3, 1>}, {pipeline_mode = #tpu.pipeline_mode<synchronous>, transform_indices = @transform_1, window_bounds = array<i64: 1, 3, 1>}, {transform_indices = @transform_2, window_bounds = array<i64: 2, 1, 256>}, {transform_indices = @transform_3, window_bounds = array<i64: 2, 3, 256>}]} {
    %c0 = arith.constant 0 : index
    %c0_0 = arith.constant 0 : index
    %c0_1 = arith.constant 0 : index
    %0 = vector.load %arg2[%c0, %c0_0, %c0_1] : memref<1x3x1xf32, #tpu.memory_space<vmem>>, vector<1x3x1xf32>
    %c0_2 = arith.constant 0 : index
    %c0_3 = arith.constant 0 : index
    %c0_4 = arith.constant 0 : index
    %1 = vector.load %arg3[%c0_2, %c0_3, %c0_4] : memref<1x3x1xf32, #tpu.memory_space<vmem>>, vector<1x3x1xf32>
    %c0_i32 = arith.constant 0 : i32
    %2 = arith.index_cast %c0_i32 : i32 to index
    %c0_5 = arith.constant 0 : index
    %c0_6 = arith.constant 0 : index
    %3 = vector.load %arg4[%2, %c0_5, %c0_6] : memref<2x1x256xf32, #tpu.memory_space<vmem>>, vector<1x1x256xf32>
    %4 = vector.broadcast %0 : vector<1x3x1xf32> to vector<1x3x256xf32>
    %5 = vector.broadcast %3 : vector<1x1x256xf32> to vector<1x3x256xf32>
    %6 = arith.mulf %4, %5 : vector<1x3x256xf32>
    %7 = vector.broadcast %1 : vector<1x3x1xf32> to vector<1x3x256xf32>
    %8 = arith.addf %6, %7 : vector<1x3x256xf32>
    %cst = arith.constant 0.000000e+00 : f32
    %9 = vector.broadcast %cst : f32 to vector<1x3x256xf32>
    %10 = arith.maximumf %8, %9 : vector<1x3x256xf32>
    %11 = arith.index_cast %c0_i32 : i32 to index
    %c0_7 = arith.constant 0 : index
    %c0_8 = arith.constant 0 : index
    %12 = vector.load %arg5[%11, %c0_7, %c0_8] : memref<2x3x256xf32, #tpu.memory_space<vmem>>, vector<1x3x256xf32>
    tpu.vector_store %arg5[%11, %c0_7, %c0_8], %10 {strides = array<i32>} : memref<2x3x256xf32, #tpu.memory_space<vmem>>, vector<1x3x256xf32>,
    %c1_i32 = arith.constant 1 : i32
    %13 = arith.index_cast %c1_i32 : i32 to index
    %c0_9 = arith.constant 0 : index
    %c0_10 = arith.constant 0 : index
    %14 = vector.load %arg4[%13, %c0_9, %c0_10] : memref<2x1x256xf32, #tpu.memory_space<vmem>>, vector<1x1x256xf32>
    %15 = vector.broadcast %0 : vector<1x3x1xf32> to vector<1x3x256xf32>
    %16 = vector.broadcast %14 : vector<1x1x256xf32> to vector<1x3x256xf32>
    %17 = arith.mulf %15, %16 : vector<1x3x256xf32>
    %18 = vector.broadcast %1 : vector<1x3x1xf32> to vector<1x3x256xf32>
    %19 = arith.addf %17, %18 : vector<1x3x256xf32>
    %cst_11 = arith.constant 0.000000e+00 : f32
    %20 = vector.broadcast %cst_11 : f32 to vector<1x3x256xf32>
    %21 = arith.maximumf %19, %20 : vector<1x3x256xf32>
    %22 = arith.index_cast %c1_i32 : i32 to index
    %c0_12 = arith.constant 0 : index
    %c0_13 = arith.constant 0 : index
    %23 = vector.load %arg5[%22, %c0_12, %c0_13] : memref<2x3x256xf32, #tpu.memory_space<vmem>>, vector<1x3x256xf32>
    tpu.vector_store %arg5[%22, %c0_12, %c0_13], %21 {strides = array<i32>} : memref<2x3x256xf32, #tpu.memory_space<vmem>>, vector<1x3x256xf32>,
    %c2_i32 = arith.constant 2 : i32
    return
  }
  func.func @transform_0(%arg0: i32, %arg1: i32) -> (i32, i32, i32) {
    %c0_i32 = arith.constant 0 : i32
    %c0_i32_0 = arith.constant 0 : i32
    %c0_i32_1 = arith.constant 0 : i32
    %c0_i32_2 = arith.constant 0 : i32
    return %c0_i32, %c0_i32_0, %c0_i32_1 : i32, i32, i32
  }
  func.func @transform_1(%arg0: i32, %arg1: i32) -> (i32, i32, i32) {
    %c0_i32 = arith.constant 0 : i32
    %c0_i32_0 = arith.constant 0 : i32
    %c0_i32_1 = arith.constant 0 : i32
    %c0_i32_2 = arith.constant 0 : i32
    return %c0_i32, %c0_i32_0, %c0_i32_1 : i32, i32, i32
  }
  func.func @transform_2(%arg0: i32, %arg1: i32) -> (i32, i32, i32) {
    %c0_i32 = arith.constant 0 : i32
    %c0_i32_0 = arith.constant 0 : i32
    return %arg0, %c0_i32, %arg1 : i32, i32, i32
  }
  func.func @transform_3(%arg0: i32, %arg1: i32) -> (i32, i32, i32) {
    %c0_i32 = arith.constant 0 : i32
    %c0_i32_0 = arith.constant 0 : i32
    return %arg0, %c0_i32, %arg1 : i32, i32, i32
  }
}

</mosaic_0001>

<bundles_post_ra>
// kernel: first_conv.2
= control target key start
LH: loop header
LB: loop body
LE: loop exit
PB: predicated region body
PF: predicated region fallthrough
CT: control target
= control target key end

     0   :  { %6 = vsyncpa [#allocation5], 0  ;;  %v110_v0 = vmov 0.0   ;;  %vm38_vm0 = vcmask 1041408   ;;  %s111_s12 = smov [#allocation4]   ;;  %s128_s0 = inlined_call_operand.vmem [shape: f32[2,256], index: 0, kind: input, shape index: {}]   ;;  %s129_s1 = inlined_call_operand.vmem [shape: f32[2], index: 1, kind: output, shape index: {}]  }
   0x1   :  { %15 = vst [vmem:[#allocation2] sm:$0xf] %v110_v0  ;;  %v10_v1 = vld [vmem:[%s128_s0] sm:$0xf]  ;;  %s79_s10 = sshll.u32 %s129_s1, 4  ;;  %s80_s10 = int_to_ptr.vmem [resolvable:$true] %s79_s10 }
   0x2   :  { %16 = vst [vmem:[#allocation3] sm:$0xf] %v110_v0  ;;  %v25_v2 = vmul.f32 %v10_v1, %v10_v1 }
   0x8   :  { %v21_v3 = vld [vmem:[#allocation2] sm:$0xf] }
   0x9   :  { %v22_v4 = vadd.f32 %v21_v3, %v10_v1  ;;  %v24_v5 = vld [vmem:[#allocation3] sm:$0xf] }
   0xa   :  { %v26_v6 = vadd.f32 %v25_v2, %v24_v5 }
   0xb   :  { %23 = vst [vmem:[#allocation2] sm:$0xf] %v22_v4 }
   0xc   :  { %27 = vst [vmem:[#allocation3] sm:$0xf] %v26_v6 }
  0x12   :  { %v31_v7 = vld [vmem:[#allocation2] sm:$0xf] }
  0x13   :  { %33 = vst [vmem:[#allocation1] ss:$4 sm:$0xff] %v31_v7  ;;  %v53_v8 = vld [vmem:[#allocation3] sm:$0xf] }
  0x1a   :  { %v34_v9 = vld.sshfl [vmem:[#allocation1] sm:$0xff pattern:$0x73625140]  ;;  %v35_v10 = vld.sshfl [vmem:[#allocation1 + $0x8] sm:$0xff pattern:$0x73625140] }
  0x1b   :  { %v39_v11 = vsel %vm38_vm0, %v34_v9, 0.0  ;;  %v40_v12 = vsel %vm38_vm0, %v35_v10, 0.0  ;;  %55 = vst [vmem:[#allocation1] ss:$4 sm:$0xff] %v53_v8 }
  0x1c   :  { %v41_v13 = vadd.f32 %v40_v12, %v39_v11 }
  0x1e   :  { %42 = vadd.xlane.f32.xlu0 %v41_v13 }
  0x22   :  { %v56_v14 = vld.sshfl [vmem:[#allocation1] sm:$0xff pattern:$0x73625140]  ;;  %v57_v15 = vld.sshfl [vmem:[#allocation1 + $0x8] sm:$0xff pattern:$0x73625140] }
  0x23   :  { %v60_v16 = vsel %vm38_vm0, %v56_v14, 0.0  ;;  %v61_v17 = vsel %vm38_vm0, %v57_v15, 0.0 }
  0x24   :  { %v62_v18 = vadd.f32 %v61_v17, %v60_v16 }
  0x26   :  { %63 = vadd.xlane.f32.xlu0 %v62_v18 }
  0x91   :  { %v43_v19 = vpop.xlane.xlu0 %42 }
  0x92   :  { %v44_v20 = vrot.slane %v43_v19, 4 }
  0x94   :  { %v45_v21 = vadd.f32 %v44_v20, %v43_v19 }
  0x96   :  { %v46_v22 = vrot.slane %v45_v21, 2 }
  0x98   :  { %v47_v23 = vadd.f32 %v46_v22, %v45_v21 }
  0x99   :  { %v64_v24 = vpop.xlane.xlu0 %63 }
  0x9a   :  { %v65_v25 = vrot.slane %v64_v24, 4  ;;  %v48_v26 = vrot.slane %v47_v23, 1 }
  0x9c   :  { %v66_v27 = vadd.f32 %v65_v25, %v64_v24  ;;  %v49_v28 = vadd.f32 %v48_v26, %v47_v23 }
  0x9e   :  { %v67_v29 = vrot.slane %v66_v27, 2  ;;  %89 = vpush %v49_v28 }
  0xa0   :  { %v68_v30 = vadd.f32 %v67_v29, %v66_v27 }
  0xa2   :  { %v69_v31 = vrot.slane %v68_v30, 1 }
  0xa4   :  { %v70_v32 = vadd.f32 %v69_v31, %v68_v30 }
  0xa6   :  { %91 = vpush %v70_v32 }
  0xcf   :  { %s90_s0 = spop %89 }
  0xd0   :  { %52 = sst [smem:[#allocation4]] %s90_s0 }
  0xd7   :  { %s92_s11 = spop %91 }
  0xd8   :  { %73 = sst [smem:[#allocation4 + $0x1]] %s92_s11 }
  0xd9   :  { %82 = dma.smem_to_vmem %s111_s12, 16, %s80_s10, [#allocation5]  }
  0xda   :  { %108 = dma.done.wait [#allocation5], 16  }
  0xdb   :  { %109 = vsyncadd [#allocation5], 4294967280 }
  0xdc   :  { %87 = sfence }
  0xdd   :  { %88 = vsyncpa [#allocation5], 1 }

// kernel: first_conv.3
= control target key start
LH: loop header
LB: loop body
LE: loop exit
PB: predicated region body
PF: predicated region fallthrough
CT: control target
= control target key end

     0   :  { %v73_v0 = vmov 0   ;;  %vm41_vm0 = vcmask 1043456   ;;  %s112_s0 = inlined_call_operand.vmem [shape: f32[1,3,1], index: 0, kind: input, shape index: {}]   ;;  %s113_s1 = inlined_call_operand.vmem [shape: f32[1,3,1], index: 1, kind: input, shape index: {}]   ;;  %s114_s2 = inlined_call_operand.vmem [shape: f32[2,1,256], index: 2, kind: input, shape index: {}]   ;;  %s115_s3 = inlined_call_operand.vmem [shape: f32[2,3,256], index: 3, kind: output, shape index: {}]  }
   0x1   :  { %72 = vset.pattern.permute.xlu0 %v73_v0  ;;  %v14_v1 = vld [vmem:[%s112_s0] sm:$0x7] }
   0x2   :  { %19 = vperm.xlu0 %72, %v14_v1   ;;  %v15_v2 = vld [vmem:[%s113_s1] sm:$0x7] }
   0x3   :  { %v16_v4 = vld [vmem:[%s114_s2] sm:$0x3]  ;;  %v69_v5 = vld [vmem:[%s114_s2 + $0x2] sm:$0x3] }
   0x4   :  { %v23_v6 = vperm.slane %v16_v4, 0  ;;  %v24_v7 = vperm.slane %v16_v4, 1  ;;  %v48_v8 = vperm.slane %v69_v5, 0  ;;  %v49_v9 = vperm.slane %v69_v5, 1 }
   0xa   :  { %31 = vperm.xlu0 %72, %v15_v2  }
  0x74   :  { %v20_v3 = vpop.permute.xlu0 %19 }
  0x75   :  { %v27_v10 = vmul.f32 %v23_v6, %v20_v3  ;;  %v28_v11 = vmul.f32 %v24_v7, %v20_v3  ;;  %v52_v12 = vmul.f32 %v48_v8, %v20_v3  ;;  %v53_v13 = vmul.f32 %v49_v9, %v20_v3 }
  0x7c   :  { %v32_v14 = vpop.permute.xlu0 %31 }
  0x7d   :  { %v34_v15 = vadd.f32 %v32_v14, %v27_v10  ;;  %v35_v16 = vadd.f32 %v32_v14, %v28_v11  ;;  %v54_v17 = vadd.f32 %v52_v12, %v32_v14  ;;  %v55_v18 = vadd.f32 %v53_v13, %v32_v14 }
  0x7f   :  { %v37_v19 = vmax.f32 %v35_v16, 0.0  ;;  %v57_v20 = vmax.f32 %v55_v18, 0.0  ;;  %v36_v21 = vmax.f32 %v34_v15, 0.0  ;;  %v56_v23 = vmax.f32 %v54_v17, 0.0 }
  0x81   :  { %v40_v22 = vrot.slane %v37_v19, 4  ;;  %v60_v24 = vrot.slane %v57_v20, 4 }
  0x83   :  { %v42_v25 = vsel %vm41_vm0, %v36_v21, %v40_v22  ;;  %v61_v26 = vsel %vm41_vm0, %v56_v23, %v60_v24 }
  0x84   :  { %44 = vst [vmem:[%s115_s3] sm:$0x77] %v42_v25 }
  0x85   :  { %70 = vst [vmem:[%s115_s3 + $0x8] sm:$0x77] %v61_v26 }

</bundles_post_ra>
